<compile_context>
chip_gen: v7x
topology: tpu7x:2x2x1
jax: 0.10.0
libtpu: 0.0.40
codegen_flags: <defaults>
</compile_context>

<pallas_src>
import jax
import jax.numpy as jnp
from jax.experimental import pallas as pl
from jax.experimental.pallas import tpu as pltpu

# ---- problem sizes (small, consistent with the module) ------------------------
B = 16            # batch
F1, F2 = 16, 24   # per-detector raw feature dims
L1, L2 = 16, 16   # per-detector latent dims  -> total_latent_size = 32
TOTAL_LATENT = L1 + L2
HIDDEN = 64       # ensemble_hidden_size
LATENT = 32       # latent_size

# ---- packed weight-slab row offsets (all multiples of 8 -> sublane aligned) ----
R_WDET  = 0                      # (F1+F2, TOTAL_LATENT) block-diag detector encoder
R_WE1   = R_WDET  + (F1 + F2)    # 40:  (TOTAL_LATENT, HIDDEN)
R_WE2   = R_WE1   + TOTAL_LATENT # 72:  (HIDDEN, LATENT)
R_WDEC1 = R_WE2   + HIDDEN       # 136: (LATENT, HIDDEN)
W_ROWS  = R_WDEC1 + LATENT       # 168 total rows
W_COLS  = 128                    # lane-padded

# ---- bias/row-slab row indices (single (8,128) tile) ---------------------------
BR_DET, BR_E1, BR_E2, BR_DEC1, BR_WDEC2, BR_BDEC2 = 0, 1, 2, 3, 4, 5


def ensemble_kernel(x_ref, w_ref, b_ref, out_ref):
    """Fused ensemble autoencoder forward for the whole (small) batch.

    x_ref : (B, F1+F2) f32      -- concat of the two detectors' prepared features
    w_ref : (W_ROWS, 128) f32   -- packed weight slab (static sublane-aligned slices)
    b_ref : (8, 128) f32        -- packed bias rows + wdec2 row
    """
    relu = lambda v: jnp.maximum(v, 0.0)

    x = x_ref[...]                                                    # (B, 40)

    # --- both synthetic detector encoders in ONE block-diagonal matmul:
    #     concat(relu(x1@wd1+b1), relu(x2@wd2+b2)) == relu(x_cat @ blockdiag + b_cat)
    lat = relu(jnp.dot(x, w_ref[R_WDET:R_WE1, :TOTAL_LATENT],
                       preferred_element_type=jnp.float32)
               + b_ref[BR_DET:BR_DET + 1, :TOTAL_LATENT])

    # --- encoder Linear(TOTAL_LATENT -> HIDDEN) + ReLU ---
    h = relu(jnp.dot(lat, w_ref[R_WE1:R_WE2, :HIDDEN],
                     preferred_element_type=jnp.float32)
             + b_ref[BR_E1:BR_E1 + 1, :HIDDEN])

    # --- encoder Linear(HIDDEN -> LATENT) + ReLU ---
    z = relu(jnp.dot(h, w_ref[R_WE2:R_WDEC1, :LATENT],
                     preferred_element_type=jnp.float32)
             + b_ref[BR_E2:BR_E2 + 1, :LATENT])

    # --- decoder Linear(LATENT -> HIDDEN) + ReLU ---
    d = relu(jnp.dot(z, w_ref[R_WDEC1:W_ROWS, :HIDDEN],
                     preferred_element_type=jnp.float32)
             + b_ref[BR_DEC1:BR_DEC1 + 1, :HIDDEN])

    # --- decoder Linear(HIDDEN -> 1) + Sigmoid on the VPU/XLU/EUP:
    #     wdec2 stored as a (1, HIDDEN) row; multiply + lane-reduce avoids a 1-lane MXU matmul.
    logits = (jnp.sum(d * b_ref[BR_WDEC2:BR_WDEC2 + 1, :HIDDEN], axis=-1, keepdims=True)
              + b_ref[BR_BDEC2:BR_BDEC2 + 1, 0:1])
    out_ref[...] = jax.nn.sigmoid(logits)


@jax.jit
def ensemble_forward(x1, x2, w_slab, b_slab):
    """x1: (B, F1) f32, x2: (B, F2) f32 -> (B, 1) f32.

    jit-ed so the concat + pallas_call are one executable (single dispatch).
    """
    batch = x1.shape[0]

    # Detector-input concat pairs with the block-diagonal W_det; fused into this
    # executable by jit (no separate eager dispatch / HBM round-trip).
    x_cat = jnp.concatenate([x1, x2], axis=1)

    flops = 2 * batch * ((F1 + F2) * TOTAL_LATENT
                         + TOTAL_LATENT * HIDDEN
                         + HIDDEN * LATENT
                         + LATENT * HIDDEN
                         + HIDDEN)                       # final row-reduce
    bytes_accessed = 4 * (x_cat.size + w_slab.size + b_slab.size + batch)

    # Single kernel invocation (no grid): everything (x_cat + 2 packed param slabs,
    # ~90 KiB total) is resident in VMEM; no per-step pipeline overhead; single
    # TensorCore is the right structure at B=16 on all of v5e/v6e/v7x.
    return pl.pallas_call(
        ensemble_kernel,
        out_shape=jax.ShapeDtypeStruct((batch, 1), jnp.float32),
        in_specs=[pl.BlockSpec(memory_space=pltpu.MemorySpace.VMEM)] * 3,
        out_specs=pl.BlockSpec(memory_space=pltpu.MemorySpace.VMEM),
        cost_estimate=pl.CostEstimate(flops=flops,
                                      transcendentals=batch,
                                      bytes_accessed=bytes_accessed),
    )(x_cat, w_slab, b_slab)


# ---------------------------- parameter init -----------------------------------
def _linear_init(key, fan_in, fan_out):
    # PyTorch nn.Linear default: U(-1/sqrt(fan_in), 1/sqrt(fan_in)); stored as (in, out)
    kw, kb = jax.random.split(key)
    bound = 1.0 / jnp.sqrt(jnp.float32(fan_in))
    w = jax.random.uniform(kw, (fan_in, fan_out), jnp.float32, -bound, bound)
    b = jax.random.uniform(kb, (1, fan_out), jnp.float32, -bound, bound)
    return w, b


def make_params(key):
    """Returns (raw_params_for_reference, (w_slab, b_slab) packed for the kernel)."""
    keys = jax.random.split(key, 6)
    wd1, bd1 = _linear_init(keys[0], F1, L1)                # detector 1 encoder (synthetic)
    wd2, bd2 = _linear_init(keys[1], F2, L2)                # detector 2 encoder (synthetic)
    we1, be1 = _linear_init(keys[2], TOTAL_LATENT, HIDDEN)  # encoder Linear 1
    we2, be2 = _linear_init(keys[3], HIDDEN, LATENT)        # encoder Linear 2
    wdec1, bdec1 = _linear_init(keys[4], LATENT, HIDDEN)    # decoder Linear 1
    wdec2, bdec2 = _linear_init(keys[5], HIDDEN, 1)         # decoder Linear 2

    # Block-diagonal detector weight: concat(x1,x2) @ W_det == [x1@wd1, x2@wd2]
    w_det = jnp.zeros((F1 + F2, TOTAL_LATENT), jnp.float32)
    w_det = w_det.at[:F1, :L1].set(wd1)
    w_det = w_det.at[F1:, L1:].set(wd2)

    # ---- single lane-padded weight slab (sublane-aligned row offsets) ----
    w_slab = jnp.zeros((W_ROWS, W_COLS), jnp.float32)
    w_slab = w_slab.at[R_WDET:R_WE1,   :TOTAL_LATENT].set(w_det)
    w_slab = w_slab.at[R_WE1:R_WE2,    :HIDDEN].set(we1)
    w_slab = w_slab.at[R_WE2:R_WDEC1,  :LATENT].set(we2)
    w_slab = w_slab.at[R_WDEC1:W_ROWS, :HIDDEN].set(wdec1)

    # ---- single (8,128) slab for biases + the wdec2 row ----
    b_slab = jnp.zeros((8, W_COLS), jnp.float32)
    b_slab = b_slab.at[BR_DET,   :L1].set(bd1[0])
    b_slab = b_slab.at[BR_DET,   L1:TOTAL_LATENT].set(bd2[0])
    b_slab = b_slab.at[BR_E1,    :HIDDEN].set(be1[0])
    b_slab = b_slab.at[BR_E2,    :LATENT].set(be2[0])
    b_slab = b_slab.at[BR_DEC1,  :HIDDEN].set(bdec1[0])
    b_slab = b_slab.at[BR_WDEC2, :HIDDEN].set(wdec2[:, 0])   # (HIDDEN,1) -> row
    b_slab = b_slab.at[BR_BDEC2, 0].set(bdec2[0, 0])

    raw = (wd1, bd1, wd2, bd2, we1, be1, we2, be2, wdec1, bdec1, wdec2, bdec2)
    return raw, (w_slab, b_slab)


def reference_forward(x1, x2, raw_params):
    (wd1, bd1, wd2, bd2, we1, be1, we2, be2, wdec1, bdec1, wdec2, bdec2) = raw_params
    relu = lambda v: jnp.maximum(v, 0.0)
    lat1 = relu(x1 @ wd1 + bd1)
    lat2 = relu(x2 @ wd2 + bd2)
    combined = jnp.concatenate([lat1, lat2], axis=1)
    h = relu(combined @ we1 + be1)
    z = relu(h @ we2 + be2)
    d = relu(z @ wdec1 + bdec1)
    return jax.nn.sigmoid(d @ wdec2 + bdec2)


if __name__ == "__main__":
    key = jax.random.PRNGKey(0)
    kp, k1, k2 = jax.random.split(key, 3)
    raw_params, (w_slab, b_slab) = make_params(kp)
    x1 = jax.random.normal(k1, (B, F1), jnp.float32)   # X_dict["detector_a"] (prepared)
    x2 = jax.random.normal(k2, (B, F2), jnp.float32)   # X_dict["detector_b"] (prepared)

    out = ensemble_forward(x1, x2, w_slab, b_slab)
    out = jax.block_until_ready(out)

    ref = reference_forward(x1, x2, raw_params)
    assert out.shape == (B, 1)
    assert jnp.allclose(out, ref, atol=1e-5, rtol=1e-5)
    print("KERNEL_OK")
</pallas_src>

<mosaic_0001>
module attributes {stable_mosaic.version = 11 : i64} {
  func.func @ensemble_kernel(%arg0: memref<16x40xf32, #tpu.memory_space<vmem>>, %arg1: memref<168x128xf32, #tpu.memory_space<vmem>>, %arg2: memref<8x128xf32, #tpu.memory_space<vmem>>, %arg3: memref<16x1xf32, #tpu.memory_space<vmem>>) attributes {dimension_semantics = [], scalar_prefetch = 0 : i64, scratch_operands = 0 : i64, tpu.core_type = #tpu.core_type<tc>} {
    %c0 = arith.constant 0 : index
    %c0_0 = arith.constant 0 : index
    %0 = vector.load %arg0[%c0, %c0_0] : memref<16x40xf32, #tpu.memory_space<vmem>>, vector<16x40xf32>
    %c0_1 = arith.constant 0 : index
    %c0_2 = arith.constant 0 : index
    %1 = vector.load %arg1[%c0_1, %c0_2] : memref<168x128xf32, #tpu.memory_space<vmem>>, vector<40x32xf32>
    %cst = arith.constant dense<0.000000e+00> : vector<16x32xf32>
    %2 = tpu.matmul %0, %1, %cst {dimension_numbers = #tpu.dot_dimension_numbers<[1], [0], [0], [1], [0, 0, 1, 1], [], []>} : vector<16x40xf32>, vector<40x32xf32>, vector<16x32xf32> -> vector<16x32xf32>
    %c0_3 = arith.constant 0 : index
    %c0_4 = arith.constant 0 : index
    %3 = vector.load %arg2[%c0_3, %c0_4] : memref<8x128xf32, #tpu.memory_space<vmem>>, vector<1x32xf32>
    %4 = vector.broadcast %3 : vector<1x32xf32> to vector<16x32xf32>
    %5 = arith.addf %2, %4 : vector<16x32xf32>
    %cst_5 = arith.constant 0.000000e+00 : f32
    %6 = vector.broadcast %cst_5 : f32 to vector<16x32xf32>
    %7 = arith.maximumf %5, %6 : vector<16x32xf32>
    %c40 = arith.constant 40 : index
    %c0_6 = arith.constant 0 : index
    %8 = vector.load %arg1[%c40, %c0_6] : memref<168x128xf32, #tpu.memory_space<vmem>>, vector<32x64xf32>
    %cst_7 = arith.constant dense<0.000000e+00> : vector<16x64xf32>
    %9 = tpu.matmul %7, %8, %cst_7 {dimension_numbers = #tpu.dot_dimension_numbers<[1], [0], [0], [1], [0, 0, 1, 1], [], []>} : vector<16x32xf32>, vector<32x64xf32>, vector<16x64xf32> -> vector<16x64xf32>
    %c1 = arith.constant 1 : index
    %c0_8 = arith.constant 0 : index
    %10 = vector.load %arg2[%c1, %c0_8] : memref<8x128xf32, #tpu.memory_space<vmem>>, vector<1x64xf32>
    %11 = vector.broadcast %10 : vector<1x64xf32> to vector<16x64xf32>
    %12 = arith.addf %9, %11 : vector<16x64xf32>
    %cst_9 = arith.constant 0.000000e+00 : f32
    %13 = vector.broadcast %cst_9 : f32 to vector<16x64xf32>
    %14 = arith.maximumf %12, %13 : vector<16x64xf32>
    %c72 = arith.constant 72 : index
    %c0_10 = arith.constant 0 : index
    %15 = vector.load %arg1[%c72, %c0_10] : memref<168x128xf32, #tpu.memory_space<vmem>>, vector<64x32xf32>
    %cst_11 = arith.constant dense<0.000000e+00> : vector<16x32xf32>
    %16 = tpu.matmul %14, %15, %cst_11 {dimension_numbers = #tpu.dot_dimension_numbers<[1], [0], [0], [1], [0, 0, 1, 1], [], []>} : vector<16x64xf32>, vector<64x32xf32>, vector<16x32xf32> -> vector<16x32xf32>
    %c2 = arith.constant 2 : index
    %c0_12 = arith.constant 0 : index
    %17 = vector.load %arg2[%c2, %c0_12] : memref<8x128xf32, #tpu.memory_space<vmem>>, vector<1x32xf32>
    %18 = vector.broadcast %17 : vector<1x32xf32> to vector<16x32xf32>
    %19 = arith.addf %16, %18 : vector<16x32xf32>
    %cst_13 = arith.constant 0.000000e+00 : f32
    %20 = vector.broadcast %cst_13 : f32 to vector<16x32xf32>
    %21 = arith.maximumf %19, %20 : vector<16x32xf32>
    %c136 = arith.constant 136 : index
    %c0_14 = arith.constant 0 : index
    %22 = vector.load %arg1[%c136, %c0_14] : memref<168x128xf32, #tpu.memory_space<vmem>>, vector<32x64xf32>
    %cst_15 = arith.constant dense<0.000000e+00> : vector<16x64xf32>
    %23 = tpu.matmul %21, %22, %cst_15 {dimension_numbers = #tpu.dot_dimension_numbers<[1], [0], [0], [1], [0, 0, 1, 1], [], []>} : vector<16x32xf32>, vector<32x64xf32>, vector<16x64xf32> -> vector<16x64xf32>
    %c3 = arith.constant 3 : index
    %c0_16 = arith.constant 0 : index
    %24 = vector.load %arg2[%c3, %c0_16] : memref<8x128xf32, #tpu.memory_space<vmem>>, vector<1x64xf32>
    %25 = vector.broadcast %24 : vector<1x64xf32> to vector<16x64xf32>
    %26 = arith.addf %23, %25 : vector<16x64xf32>
    %cst_17 = arith.constant 0.000000e+00 : f32
    %27 = vector.broadcast %cst_17 : f32 to vector<16x64xf32>
    %28 = arith.maximumf %26, %27 : vector<16x64xf32>
    %c4 = arith.constant 4 : index
    %c0_18 = arith.constant 0 : index
    %29 = vector.load %arg2[%c4, %c0_18] : memref<8x128xf32, #tpu.memory_space<vmem>>, vector<1x64xf32>
    %30 = vector.broadcast %29 : vector<1x64xf32> to vector<16x64xf32>
    %31 = arith.mulf %28, %30 : vector<16x64xf32>
    %cst_19 = arith.constant dense<0.000000e+00> : vector<16xf32>
    %32 = vector.multi_reduction <add>, %31, %cst_19 [1] : vector<16x64xf32> to vector<16xf32>
    %33 = vector.shape_cast %32 : vector<16xf32> to vector<16x1xf32>
    %c5 = arith.constant 5 : index
    %c0_20 = arith.constant 0 : index
    %34 = vector.load %arg2[%c5, %c0_20] : memref<8x128xf32, #tpu.memory_space<vmem>>, vector<1x1xf32>
    %35 = vector.broadcast %34 : vector<1x1xf32> to vector<16x1xf32>
    %36 = arith.addf %33, %35 : vector<16x1xf32>
    %37 = arith.negf %36 : vector<16x1xf32>
    %38 = math.exp %37 : vector<16x1xf32>
    %cst_21 = arith.constant 1.000000e+00 : f32
    %39 = vector.broadcast %cst_21 : f32 to vector<16x1xf32>
    %40 = arith.addf %39, %38 : vector<16x1xf32>
    %41 = arith.divf %39, %40 : vector<16x1xf32>
    %c0_22 = arith.constant 0 : index
    %c0_23 = arith.constant 0 : index
    %42 = vector.load %arg3[%c0_22, %c0_23] : memref<16x1xf32, #tpu.memory_space<vmem>>, vector<16x1xf32>
    tpu.vector_store %arg3[%c0_22, %c0_23], %41 {strides = array<i32>} : memref<16x1xf32, #tpu.memory_space<vmem>>, vector<16x1xf32>,
    return
  }
}

</mosaic_0001>

<bundles_post_ra>
// kernel: ensemble_forward.1
= control target key start
LH: loop header
LB: loop body
LE: loop exit
PB: predicated region body
PF: predicated region fallthrough
CT: control target
= control target key end

     0   :  { %8 = vsyncpa [#allocation3], 0  ;;  %s620_s12 = smov [#allocation2]   ;;  %s695_s0 = inlined_call_operand.vmem [shape: f32[16,40], index: 0, kind: input, shape index: {}]   ;;  %s696_s1 = inlined_call_operand.hbm [shape: f32[168,128], index: 1, kind: input, shape index: {}]   ;;  %s697_s2 = inlined_call_operand.vmem [shape: f32[8,128], index: 2, kind: input, shape index: {}]   ;;  %s698_s3 = inlined_call_operand.vmem [shape: f32[16,1], index: 3, kind: output, shape index: {}]  }
   0x1   :  { %s16_s13 = sshll.u32 %s620_s12, 4  ;;  %s596_s16 = scalar_lea.hbm %s696_s1, 2688  ;;  %s17_s13 = int_to_ptr.vmem [resolvable:$true] %s16_s13 }
   0x2   :  { %p597_p0 = scmp.ne.s32.totalorder %s696_s1, %s596_s16  ;;  %p600_p1 = scmp.lt.u32.totalorder %s596_s16, %s696_s1 }
   0x4   :  { %p602_p2 = pnand %p600_p1, %p597_p0 }
   0x6   :  { %605 = shalt.err (!%p602_p2)
}
   0x7   :  { %s606_s21 = scalar_lea.vmem %s17_s13, 2688  ;;  %p611_p4 = scmp.lt.s32.totalorder %s17_s13, %s17_s13 }
   0x8   :  { %p607_p3 = scmp.ne.s32.totalorder %s17_s13, %s606_s21  ;;  %p612_p5 = scmp.lt.s32.totalorder %s606_s21, %s606_s21 }
   0xa   :  { %p613_p6 = por %p612_p5, %p611_p4 }
   0xc   :  { %p614_p7 = pnand %p613_p6, %p607_p3 }
   0xe   :  { %617 = shalt.err (!%p614_p7)
}
   0xf   :  { %s621_s22 = smov 128   ;;  %s622_s23 = smov 8  }
  0x10   :  { %22 = dma.hbm_to_vmem [thread:$0]  %s696_s1, 2688, %s17_s13, [#allocation3], %s621_s22, %s621_s22, %s622_s23  }
  0x11   :  { %618 = dma.done.wait [#allocation3], 2688  }
  0x12   :  { %619 = vsyncadd [#allocation3], 4294964608  ;;  %vm40_vm0 = vcmask 326656   ;;  %v30_v0 = vld [vmem:[#allocation2] sm:$0xff]  ;;  %v31_v1 = vld [vmem:[#allocation2 + $0x8] sm:$0xff]  ;;  %vm133_vm1 = vcmask 261120  }
  0x13   :  { %v32_v2 = vld [vmem:[#allocation2 + $0x10] sm:$0xff]  ;;  %v545_v3 = vpack.c.bf16 %v31_v1, %v30_v0  ;;  %v33_v4 = vld [vmem:[#allocation2 + $0x18] sm:$0xff]  ;;  %v28_v5 = vld [vmem:[%s695_s0] sm:$0xff]  ;;  %vm230_vm2 = vcmask 523264   ;;  %vm438_vm3 = vcmask 7168  }
  0x14   :  { %v549_v6 = vpack.c.bf16 %v33_v4, %v32_v2  ;;  %501 = vmatprep.mubr.msk.f32.mxu0 %vm40_vm0, %v28_v5  ;;  %v124_v7 = vld [vmem:[#allocation2 + $0x28] sm:$0xff]  ;;  %v125_v8 = vld [vmem:[#allocation2 + $0x30] sm:$0xff]  ;;  %v34_v10 = vld [vmem:[#allocation2 + $0x20] sm:$0xff] }
  0x15   :  { %546 = vmatprep.subr.bf16.mxu0 %v545_v3  ;;  %v553_v9 = vpack.c.bf16 %v125_v8, %v124_v7  ;;  %v29_v11 = vld [vmem:[%s695_s0 + $0x8] sm:$0xff]  ;;  %v126_v12 = vld [vmem:[#allocation2 + $0x38] sm:$0xff]  ;;  %v127_v13 = vld [vmem:[#allocation2 + $0x40] sm:$0xff] }
  0x16   :  { %548 = vmatpush3.bf16.msra.mxu0 %v545_v3  ;;  %v557_v14 = vpack.c.bf16 %v127_v13, %v126_v12  ;;  %v217_v15 = vld [vmem:[#allocation2 + $0x48] sm:$0xff]  ;;  %v218_v16 = vld [vmem:[#allocation2 + $0x50] sm:$0xff]  ;;  %v446_v18 = vld [vmem:[%s697_s2] ss:$0 sm:$0xff] }
  0x17   :  { %550 = vmatprep.subr.bf16.mxu0 %v549_v6  ;;  %554 = vmatprep.subr.bf16.mxu1 %v553_v9  ;;  %v561_v17 = vpack.c.bf16 %v218_v16, %v217_v15  ;;  %v219_v23 = vld [vmem:[#allocation2 + $0x58] sm:$0xff]  ;;  %v220_v24 = vld [vmem:[#allocation2 + $0x60] sm:$0xff]  ;;  %v221_v28 = vld [vmem:[#allocation2 + $0x68] sm:$0xff] }
  0x18   :  { %556 = vmatpush3.bf16.msra.mxu1 %v553_v9  ;;  %v565_v27 = vpack.c.bf16 %v220_v24, %v219_v23  ;;  %v222_v29 = vld [vmem:[#allocation2 + $0x70] sm:$0xff]  ;;  %v223_v31 = vld [vmem:[#allocation2 + $0x78] sm:$0xff]  ;;  %v224_v32 = vld [vmem:[#allocation2 + $0x80] sm:$0xff] }
  0x19   :  { %558 = vmatprep.subr.bf16.mxu1 %v557_v14  ;;  %v569_v30 = vpack.c.bf16 %v222_v29, %v221_v28  ;;  %v573_v33 = vpack.c.bf16 %v224_v32, %v223_v31  ;;  %v314_v34 = vld [vmem:[#allocation2 + $0x88] sm:$0xff]  ;;  %v315_v35 = vld [vmem:[#allocation2 + $0x90] sm:$0xff]  ;;  %v449_v37 = vld [vmem:[%s697_s2 + $0x1] ss:$0 sm:$0xff] }
  0x1a   :  { %552 = vmatpush3.bf16.msra.mxu0 %v549_v6  ;;  %v577_v36 = vpack.c.bf16 %v315_v35, %v314_v34  ;;  %v316_v44 = vld [vmem:[#allocation2 + $0x98] sm:$0xff]  ;;  %v317_v45 = vld [vmem:[#allocation2 + $0xa0] sm:$0xff] }
  0x1b   :  { %499 = vmatprep.subr.mxu0 %v34_v10  ;;  %v581_v46 = vpack.c.bf16 %v317_v45, %v316_v44  ;;  %v452_v47 = vld [vmem:[%s697_s2 + $0x2] ss:$0 sm:$0xff]  ;;  %v455_v54 = vld [vmem:[%s697_s2 + $0x3] ss:$0 sm:$0xff]  ;;  %v458_v59 = vld [vmem:[%s697_s2 + $0x4] ss:$0 sm:$0xff] }
  0x1c   :  { %560 = vmatpush3.bf16.msra.mxu1 %v557_v14  ;;  %v459_v2 = vld [vmem:[%s697_s2 + $0x5] ss:$0 sm:$0xff] }
  0x1d   :  { %562 = vmatprep.subr.bf16.mxu1 %v561_v17 }
  0x1e   :  { %500 = vmatpush3.msra.mxu0 %v34_v10 }
  0x1f   :  { %502 = vmatmul.mubr.msk.f32.vlgmr.msra.gmra.mrb[0].mxu0 %vm40_vm0, %v29_v11  ;;  %578 = vmatprep.subr.bf16.mxu0 %v577_v36 }
  0x20   :  { %580 = vmatpush3.bf16.msra.mxu0 %v577_v36 }
  0x21   :  { %582 = vmatprep.subr.bf16.mxu0 %v581_v46 }
  0x24   :  { %584 = vmatpush3.bf16.msra.mxu0 %v581_v46 }
  0xf2   :  { %v503_v19 = vpop.f32.mrb[0].mxu0 }
  0xf3   :  { %v119_v20 = vadd.f32 %v503_v19, %v446_v18  ;;  %v113_v21 = vpop.f32.mrb[1].mxu0 }
  0xf4   :  { %v114_v22 = vadd.f32 %v446_v18, %v113_v21 }
  0xf5   :  { %v123_v26 = vmax.f32 %v119_v20, 0.0 }
  0xf6   :  { %v122_v25 = vmax.f32 %v114_v22, 0.0 }
  0xf8   :  { %512 = vmatprep.mubr.msk.f32.mxu1 %vm133_vm1, %v122_v25 }
  0xf9   :  { %513 = vmatmul.mubr.msk.f32.vlgmr.msra.gmra.mrb[0].mxu1 %vm133_vm1, %v123_v26 }
  0xfa   :  { %564 = vmatpush3.bf16.msra.mxu1 %v561_v17 }
  0xfb   :  { %566 = vmatprep.subr.bf16.mxu1 %v565_v27 }
  0xfe   :  { %568 = vmatpush3.bf16.msra.mxu1 %v565_v27 }
  0xff   :  { %570 = vmatprep.subr.bf16.mxu1 %v569_v30 }
 0x102   :  { %572 = vmatpush3.bf16.msra.mxu1 %v569_v30 }
 0x103   :  { %574 = vmatprep.subr.bf16.mxu1 %v573_v33 }
 0x106   :  { %576 = vmatpush3.bf16.msra.mxu1 %v573_v33 }
 0x1cc   :  { %v514_v38 = vpop.f32.mrb[0].mxu1 }
 0x1cd   :  { %v212_v39 = vadd.f32 %v514_v38, %v449_v37  ;;  %v206_v40 = vpop.f32.mrb[1].mxu1 }
 0x1ce   :  { %v207_v41 = vadd.f32 %v449_v37, %v206_v40 }
 0x1cf   :  { %v216_v43 = vmax.f32 %v212_v39, 0.0 }
 0x1d0   :  { %v215_v42 = vmax.f32 %v207_v41, 0.0 }
 0x1d2   :  { %531 = vmatprep.mubr.msk.f32.mxu1 %vm230_vm2, %v215_v42 }
 0x1d3   :  { %532 = vmatmul.mubr.msk.f32.vlgmr.msra.gmra.mrb[2].mxu1 %vm230_vm2, %v216_v43 }
 0x2a6   :  { %v533_v48 = vpop.f32.mrb[2].mxu1 }
 0x2a7   :  { %v309_v49 = vadd.f32 %v533_v48, %v452_v47  ;;  %v303_v50 = vpop.f32.mrb[3].mxu1 }
 0x2a8   :  { %v304_v51 = vadd.f32 %v452_v47, %v303_v50 }
 0x2a9   :  { %v313_v53 = vmax.f32 %v309_v49, 0.0 }
 0x2aa   :  { %v312_v52 = vmax.f32 %v304_v51, 0.0 }
 0x2ac   :  { %542 = vmatprep.mubr.msk.f32.mxu0 %vm133_vm1, %v312_v52 }
 0x2ad   :  { %543 = vmatmul.mubr.msk.f32.vlgmr.msra.gmra.mrb[2].mxu0 %vm133_vm1, %v313_v53 }
 0x380   :  { %v544_v55 = vpop.f32.mrb[2].mxu0 }
 0x381   :  { %v401_v56 = vadd.f32 %v544_v55, %v455_v54  ;;  %v395_v57 = vpop.f32.mrb[3].mxu0 }
 0x382   :  { %v396_v58 = vadd.f32 %v455_v54, %v395_v57 }
 0x383   :  { %v405_v60 = vmax.f32 %v401_v56, 0.0 }
 0x384   :  { %v404_v61 = vmax.f32 %v396_v58, 0.0 }
 0x385   :  { %v412_v0 = vmul.f32 %v458_v59, %v405_v60 }
 0x386   :  { %v411_v62 = vmul.f32 %v458_v59, %v404_v61 }
 0x387   :  { %v416_v1 = vsel %vm230_vm2, %v412_v0, 0.0 }
 0x388   :  { %v413_v63 = vsel %vm230_vm2, %v411_v62, 0.0 }
 0x389   :  { %414 = vadd.xlane.f32.xlu0 %v413_v63 }
 0x38d   :  { %417 = vadd.xlane.f32.xlu0 %v416_v1 }
 0x416   :  { %v415_v3 = vpop.xlane.xlu0 %414 }
 0x417   :  { %v424_v4 = vadd.f32 %v459_v2, %v415_v3 }
 0x419   :  { %v460_v5 = vmul.f32 -1.442695, %v424_v4 }
 0x41a   :  { %v418_v6 = vpop.xlane.xlu0 %417 }
 0x41b   :  { %588 = vpow2.f32 %v460_v5  ;;  %v425_v7 = vadd.f32 %v459_v2, %v418_v6 }
 0x41d   :  { %v461_v8 = vmul.f32 -1.442695, %v425_v7 }
 0x41f   :  { %590 = vpow2.f32 %v461_v8 }
 0x425   :  { %v589_v9 = vpop.eup %588 }
 0x426   :  { %v432_v10 = vadd.f32 1.0, %v589_v9 }
 0x428   :  { %592 = vrcp.f32 %v432_v10 }
 0x429   :  { %v591_v11 = vpop.eup %590 }
 0x42a   :  { %v433_v12 = vadd.f32 1.0, %v591_v11 }
 0x42c   :  { %594 = vrcp.f32 %v433_v12 }
 0x432   :  { %v593_v13 = vpop.eup %592 }
 0x433   :  { %439 = vst.msk [vmem:[%s698_s3] sm:$0xff] %vm438_vm3, %v593_v13 }
 0x436   :  { %v595_v14 = vpop.eup %594 }
 0x437   :  { %440 = vst.msk [vmem:[%s698_s3 + $0x8] sm:$0xff] %vm438_vm3, %v595_v14 }
 0x438   :  { %445 = vsyncpa [#allocation3], 1 }

</bundles_post_ra>
